<compile_context>
chip_gen: v6e
topology: v6e:2x2x1
jax: 0.10.0
libtpu: 0.0.40
codegen_flags: <defaults>
</compile_context>

<pallas_src>
import jax
import jax.numpy as jnp
from jax.experimental import pallas as pl
from jax.experimental.pallas import tpu as pltpu

IN_F = 6
HID_F = 50
OUT_F = 80

HID_PAD = 128   # lane-align the hidden dim (only inside the weights)

DEFAULT_BLOCK_B = 2048  # ~4.3 MiB double-buffered tiles: fits v5e/v6e/v7x default VMEM


def _round_up(n, m):
    return ((n + m - 1) // m) * m


def _mlp_kernel(x_ref, w1_ref, b1_ref, w2_ref, b2_ref, o_ref):
    # fc1 (MXU, f32 accumulate) + bias + ReLU.  Padded hidden columns are
    # exactly zero (zero weights/bias, relu(0)=0) so they contribute nothing.
    h = jnp.dot(x_ref[...], w1_ref[...],
                preferred_element_type=jnp.float32,
                precision=jax.lax.Precision.HIGHEST)
    h = jnp.maximum(h + b1_ref[...], 0.0)
    # fc2 (MXU, f32 accumulate) + bias.  W2 is stored (HID_PAD, OUT_F) so the
    # result is already the real 80-wide output: no padded store, no slice.
    y = jnp.dot(h, w2_ref[...],
                preferred_element_type=jnp.float32,
                precision=jax.lax.Precision.HIGHEST)
    o_ref[...] = (y + b2_ref[...]).astype(o_ref.dtype)


def prepare_params(w1, b1, w2, b2):
    """One-time parameter prep: pad to the kernel's resident VMEM layout.

    w1: (6, 50), b1: (50,), w2: (50, 80), b2: (80,)  ->
    w1_p: (6, 128), b1_p: (1, 128), w2_p: (128, 80), b2_p: (1, 80)
    """
    w1_p = jnp.zeros((IN_F, HID_PAD), jnp.float32).at[:, :HID_F].set(w1)
    b1_p = jnp.zeros((1, HID_PAD), jnp.float32).at[0, :HID_F].set(b1)
    w2_p = jnp.zeros((HID_PAD, OUT_F), jnp.float32).at[:HID_F, :].set(w2)
    b2_p = b2.astype(jnp.float32).reshape(1, OUT_F)
    return w1_p, b1_p, w2_p, b2_p


def mlp_forward(x, params, *, block_b=DEFAULT_BLOCK_B):
    """x: (B, 6) f32, params: output of prepare_params -> (B, 80) f32."""
    w1_p, b1_p, w2_p, b2_p = params
    x = x.astype(jnp.float32)
    B = x.shape[0]

    # Batch tile: multiple of 8 (sublane), capped at block_b for VMEM budget.
    # With block_b=2048, batches > 2048 produce >=2 grid steps (v7x megacore).
    TB = min(block_b, _round_up(B, 8))
    B_pad = _round_up(B, TB)

    # Pad the batch only when needed (tail-concat; no full scatter copy).
    if B_pad == B:
        x_p = x
    else:
        x_p = jnp.concatenate(
            [x, jnp.zeros((B_pad - B, IN_F), jnp.float32)], axis=0)

    grid = (B_pad // TB,)

    out = pl.pallas_call(
        _mlp_kernel,
        out_shape=jax.ShapeDtypeStruct((B_pad, OUT_F), jnp.float32),
        grid=grid,
        in_specs=[
            pl.BlockSpec((TB, IN_F), lambda i: (i, 0)),          # x: batch-tiled
            pl.BlockSpec((IN_F, HID_PAD), lambda i: (0, 0)),     # W1: resident
            pl.BlockSpec((1, HID_PAD), lambda i: (0, 0)),        # b1: resident
            pl.BlockSpec((HID_PAD, OUT_F), lambda i: (0, 0)),    # W2: resident
            pl.BlockSpec((1, OUT_F), lambda i: (0, 0)),          # b2: resident
        ],
        out_specs=pl.BlockSpec((TB, OUT_F), lambda i: (i, 0)),   # real 80-wide store
        compiler_params=pltpu.CompilerParams(
            dimension_semantics=("parallel",),  # megacore sharding on v7x; no-op elsewhere
        ),
    )(x_p, w1_p, b1_p, w2_p, b2_p)

    return out if B_pad == B else out[:B]


def init_params(key):
    """Deterministic init mirroring nn.Linear default (uniform +/- 1/sqrt(fan_in))."""
    k1, k2, k3, k4 = jax.random.split(key, 4)
    bound1 = 1.0 / jnp.sqrt(jnp.float32(IN_F))
    bound2 = 1.0 / jnp.sqrt(jnp.float32(HID_F))
    w1 = jax.random.uniform(k1, (IN_F, HID_F), jnp.float32, -bound1, bound1)
    b1 = jax.random.uniform(k2, (HID_F,), jnp.float32, -bound1, bound1)
    w2 = jax.random.uniform(k3, (HID_F, OUT_F), jnp.float32, -bound2, bound2)
    b2 = jax.random.uniform(k4, (OUT_F,), jnp.float32, -bound2, bound2)
    return w1, b1, w2, b2


if __name__ == "__main__":
    key = jax.random.PRNGKey(0)
    pkey, xkey = jax.random.split(key)
    w1, b1, w2, b2 = init_params(pkey)
    params = prepare_params(w1, b1, w2, b2)   # one-time padded layout

    batch = 8
    x = jax.random.normal(xkey, (batch, IN_F), jnp.float32)

    out = mlp_forward(x, params)
    jax.block_until_ready(out)

    # Reference check in plain JAX (f32 end-to-end, so tight tolerance is fine).
    ref = jnp.maximum(x @ w1 + b1, 0.0) @ w2 + b2
    assert out.shape == (batch, OUT_F)
    assert jnp.allclose(out, ref, atol=1e-5, rtol=1e-5)

    # Also exercise a non-tile-aligned batch to cover the padding path.
    x2 = jax.random.normal(jax.random.PRNGKey(1), (13, IN_F), jnp.float32)
    out2 = mlp_forward(x2, params)
    jax.block_until_ready(out2)
    ref2 = jnp.maximum(x2 @ w1 + b1, 0.0) @ w2 + b2
    assert out2.shape == (13, OUT_F)
    assert jnp.allclose(out2, ref2, atol=1e-5, rtol=1e-5)

    print("KERNEL_OK")
</pallas_src>

<mosaic_0001>
module attributes {stable_mosaic.version = 11 : i64} {
  func.func @_mlp_kernel(%arg0: i32, %arg1: memref<8x6xf32, #tpu.memory_space<vmem>>, %arg2: memref<6x128xf32, #tpu.memory_space<vmem>>, %arg3: memref<1x128xf32, #tpu.memory_space<vmem>>, %arg4: memref<128x80xf32, #tpu.memory_space<vmem>>, %arg5: memref<1x80xf32, #tpu.memory_space<vmem>>, %arg6: memref<8x80xf32, #tpu.memory_space<vmem>>) attributes {dimension_semantics = [#tpu.dimension_semantics<parallel>], iteration_bounds = array<i64: 1>, scalar_prefetch = 0 : i64, scratch_operands = 0 : i64, tpu.core_type = #tpu.core_type<tc>, window_params = [{transform_indices = @transform_0, window_bounds = array<i64: 8, 6>}, {pipeline_mode = #tpu.pipeline_mode<synchronous>, transform_indices = @transform_1, window_bounds = array<i64: 6, 128>}, {pipeline_mode = #tpu.pipeline_mode<synchronous>, transform_indices = @transform_2, window_bounds = array<i64: 1, 128>}, {pipeline_mode = #tpu.pipeline_mode<synchronous>, transform_indices = @transform_3, window_bounds = array<i64: 128, 80>}, {pipeline_mode = #tpu.pipeline_mode<synchronous>, transform_indices = @transform_4, window_bounds = array<i64: 1, 80>}, {transform_indices = @transform_5, window_bounds = array<i64: 8, 80>}]} {
    %c0 = arith.constant 0 : index
    %c0_0 = arith.constant 0 : index
    %0 = vector.load %arg1[%c0, %c0_0] : memref<8x6xf32, #tpu.memory_space<vmem>>, vector<8x6xf32>
    %c0_1 = arith.constant 0 : index
    %c0_2 = arith.constant 0 : index
    %1 = vector.load %arg2[%c0_1, %c0_2] : memref<6x128xf32, #tpu.memory_space<vmem>>, vector<6x128xf32>
    %cst = arith.constant dense<0.000000e+00> : vector<8x128xf32>
    %2 = tpu.matmul %0, %1, %cst {dimension_numbers = #tpu.dot_dimension_numbers<[1], [0], [0], [1], [0, 0, 1, 1], [], []>, precision = #tpu.contract_precision<fp32>} : vector<8x6xf32>, vector<6x128xf32>, vector<8x128xf32> -> vector<8x128xf32>
    %c0_3 = arith.constant 0 : index
    %c0_4 = arith.constant 0 : index
    %3 = vector.load %arg3[%c0_3, %c0_4] : memref<1x128xf32, #tpu.memory_space<vmem>>, vector<1x128xf32>
    %4 = vector.broadcast %3 : vector<1x128xf32> to vector<8x128xf32>
    %5 = arith.addf %2, %4 : vector<8x128xf32>
    %cst_5 = arith.constant 0.000000e+00 : f32
    %6 = vector.broadcast %cst_5 : f32 to vector<8x128xf32>
    %7 = arith.maximumf %5, %6 : vector<8x128xf32>
    %c0_6 = arith.constant 0 : index
    %c0_7 = arith.constant 0 : index
    %8 = vector.load %arg4[%c0_6, %c0_7] : memref<128x80xf32, #tpu.memory_space<vmem>>, vector<128x80xf32>
    %cst_8 = arith.constant dense<0.000000e+00> : vector<8x80xf32>
    %9 = tpu.matmul %7, %8, %cst_8 {dimension_numbers = #tpu.dot_dimension_numbers<[1], [0], [0], [1], [0, 0, 1, 1], [], []>, precision = #tpu.contract_precision<fp32>} : vector<8x128xf32>, vector<128x80xf32>, vector<8x80xf32> -> vector<8x80xf32>
    %c0_9 = arith.constant 0 : index
    %c0_10 = arith.constant 0 : index
    %10 = vector.load %arg5[%c0_9, %c0_10] : memref<1x80xf32, #tpu.memory_space<vmem>>, vector<1x80xf32>
    %11 = vector.broadcast %10 : vector<1x80xf32> to vector<8x80xf32>
    %12 = arith.addf %9, %11 : vector<8x80xf32>
    %c0_11 = arith.constant 0 : index
    %c0_12 = arith.constant 0 : index
    %13 = vector.load %arg6[%c0_11, %c0_12] : memref<8x80xf32, #tpu.memory_space<vmem>>, vector<8x80xf32>
    tpu.vector_store %arg6[%c0_11, %c0_12], %12 {strides = array<i32>} : memref<8x80xf32, #tpu.memory_space<vmem>>, vector<8x80xf32>,
    return
  }
  func.func @transform_0(%arg0: i32) -> (i32, i32) {
    %c0_i32 = arith.constant 0 : i32
    %c0_i32_0 = arith.constant 0 : i32
    return %arg0, %c0_i32 : i32, i32
  }
  func.func @transform_1(%arg0: i32) -> (i32, i32) {
    %c0_i32 = arith.constant 0 : i32
    %c0_i32_0 = arith.constant 0 : i32
    %c0_i32_1 = arith.constant 0 : i32
    return %c0_i32, %c0_i32_0 : i32, i32
  }
  func.func @transform_2(%arg0: i32) -> (i32, i32) {
    %c0_i32 = arith.constant 0 : i32
    %c0_i32_0 = arith.constant 0 : i32
    %c0_i32_1 = arith.constant 0 : i32
    return %c0_i32, %c0_i32_0 : i32, i32
  }
  func.func @transform_3(%arg0: i32) -> (i32, i32) {
    %c0_i32 = arith.constant 0 : i32
    %c0_i32_0 = arith.constant 0 : i32
    %c0_i32_1 = arith.constant 0 : i32
    return %c0_i32, %c0_i32_0 : i32, i32
  }
  func.func @transform_4(%arg0: i32) -> (i32, i32) {
    %c0_i32 = arith.constant 0 : i32
    %c0_i32_0 = arith.constant 0 : i32
    %c0_i32_1 = arith.constant 0 : i32
    return %c0_i32, %c0_i32_0 : i32, i32
  }
  func.func @transform_5(%arg0: i32) -> (i32, i32) {
    %c0_i32 = arith.constant 0 : i32
    %c0_i32_0 = arith.constant 0 : i32
    return %arg0, %c0_i32 : i32, i32
  }
}

</mosaic_0001>

<bundles_post_ra>
// kernel: tpu_custom_call.1
= control target key start
LH: loop header
LB: loop body
LE: loop exit
PB: predicated region body
PF: predicated region fallthrough
CT: control target
= control target key end

     0   :  { %vm34_vm0 = vcmask 1045504   ;;  %v1546_v2 = vmov 0.0   ;;  %vm1547_vm1 = vmmov 0   ;;  %vm30_vm2 = vcmask 48128   ;;  %s2019_s0 = inlined_call_operand.vmem [shape: f32[8,6], index: 0, kind: input, shape index: {}]   ;;  %s2020_s1 = inlined_call_operand.vmem [shape: f32[6,128], index: 1, kind: input, shape index: {}]   ;;  %s2021_s2 = inlined_call_operand.vmem [shape: f32[1,128], index: 2, kind: input, shape index: {}]   ;;  %s2022_s3 = inlined_call_operand.vmem [shape: f32[128,80], index: 3, kind: input, shape index: {}]   ;;  %s2023_s4 = inlined_call_operand.vmem [shape: f32[1,80], index: 4, kind: input, shape index: {}]   ;;  %s2024_s5 = inlined_call_operand.hbm [shape: f32[8,80], index: 5, kind: output, shape index: {}]  }
   0x1   :  { %v22_v0 = vld [vmem:[%s2020_s1] sm:$0x3f]  ;;  %1281 = vmatprep.subr.mxu0 %v1546_v2  ;;  %1283 = vmatprep.mubr.msk.f32.mxu0 %vm1547_vm1, %v1546_v2  ;;  %v500_v4 = vld [vmem:[%s2022_s3 + $0x78] sm:$0xff]  ;;  %v499_v5 = vld [vmem:[%s2022_s3 + $0x70] sm:$0xff] }
   0x2   :  { %v21_v1 = vld [vmem:[%s2019_s0] sm:$0xff]  ;;  %v36_v3 = vsel %vm34_vm0, %v22_v0, 0  ;;  %1286 = vmatprep.subr.mxu1 %v1546_v2  ;;  %1288 = vmatprep.mubr.msk.f32.mxu1 %vm1547_vm1, %v1546_v2  ;;  %v1597_v8 = vand.u32 4294901760, %v500_v4  ;;  %v498_v10 = vld [vmem:[%s2022_s3 + $0x68] sm:$0xff]  ;;  %v1602_v12 = vand.u32 4294901760, %v499_v5 }
   0x3   :  { %v69_v6 = vand.u32 4294901760, %v36_v3  ;;  %v32_v7 = vsel %vm30_vm2, %v21_v1, 0 }
   0x4   :  { %v104_v9 = vand.u32 4294901760, %v32_v7 }
   0x5   :  { %1282 = vmatpush3.msra.mxu0 %v69_v6  ;;  %v146_v11 = vsub.f32 %v36_v3, %v69_v6 }
   0x6   :  { %10 = vsyncpa [#allocation3], 0  ;;  %1291 = vmatprep.subr.mxu0 %v1546_v2  ;;  %v105_v13 = vsub.f32 %v32_v7, %v104_v9  ;;  %v497_v14 = vld [vmem:[%s2022_s3 + $0x60] sm:$0xff]  ;;  %v1609_v16 = vsub.f32 %v500_v4, %v1597_v8  ;;  %v1611_v17 = vand.u32 4294901760, %v498_v10  ;;  %v496_v19 = vld [vmem:[%s2022_s3 + $0x58] sm:$0xff]  ;;  %v1617_v21 = vsub.f32 %v499_v5, %v1602_v12  ;;  %s1548_s27 = smov [#allocation2]  }
   0x7   :  { %v147_v15 = vand.u32 4294901760, %v146_v11  ;;  %v1619_v22 = vand.u32 4294901760, %v497_v14  ;;  %v495_v24 = vld [vmem:[%s2022_s3 + $0x50] sm:$0xff]  ;;  %v1628_v28 = vand.u32 4294901760, %v496_v19  ;;  %v494_v30 = vld [vmem:[%s2022_s3 + $0x48] sm:$0xff]  ;;  %v493_v34 = vld [vmem:[%s2022_s3 + $0x40] sm:$0xff] }
   0x8   :  { %v106_v18 = vand.u32 4294901760, %v105_v13  ;;  %v602_v26 = vand.u32 4294901760, %v1609_v16  ;;  %v1626_v27 = vsub.f32 %v498_v10, %v1611_v17  ;;  %v609_v31 = vand.u32 4294901760, %v1617_v21  ;;  %v492_v63 = vld [vmem:[%s2022_s3 + $0x38] sm:$0xff]  ;;  %v491_v1 = vld [vmem:[%s2022_s3 + $0x30] sm:$0xff]  ;;  %v490_v5 = vld [vmem:[%s2022_s3 + $0x28] sm:$0xff] }
   0x9   :  { %v148_v20 = vsub.f32 %v146_v11, %v147_v15  ;;  %v1635_v32 = vsub.f32 %v497_v14, %v1619_v22  ;;  %v1637_v33 = vand.u32 4294901760, %v495_v24  ;;  %v1648_v37 = vsub.f32 %v496_v19, %v1628_v28  ;;  %v489_v10 = vld [vmem:[%s2022_s3 + $0x20] sm:$0xff]  ;;  %s1157_s28 = sshll.u32 %s1548_s27, 4  ;;  %s1158_s28 = int_to_ptr.vmem [resolvable:$true] %s1157_s28 }
   0xa   :  { %v107_v23 = vsub.f32 %v105_v13, %v106_v18  ;;  %v603_v35 = vsub.f32 %v1609_v16, %v602_v26  ;;  %v616_v36 = vand.u32 4294901760, %v1626_v27  ;;  %v1650_v38 = vand.u32 4294901760, %v494_v30  ;;  %s1524_s29 = scalar_lea.vmem %s1158_s28, 128  ;;  %p1529_p1 = scmp.lt.s32.totalorder %s1158_s28, %s1158_s28 }
   0xb   :  { %v149_v25 = vand.u32 4294901760, %v148_v20  ;;  %v610_v39 = vsub.f32 %v1617_v21, %v609_v31  ;;  %v623_v40 = vand.u32 4294901760, %v1635_v32  ;;  %v1662_v41 = vsub.f32 %v495_v24, %v1637_v33  ;;  %p1525_p0 = scmp.ne.s32.totalorder %s1158_s28, %s1524_s29  ;;  %p1530_p2 = scmp.lt.s32.totalorder %s1524_s29, %s1524_s29 }
   0xc   :  { %v108_v29 = vand.u32 4294901760, %v107_v23  ;;  %v1664_v42 = vand.u32 4294901760, %v493_v34  ;;  %v604_v43 = vand.u32 4294901760, %v603_v35  ;;  %v617_v44 = vsub.f32 %v1626_v27, %v616_v36 }
   0xd   :  { %1287 = vmatpush3.msra.mxu1 %v149_v25  ;;  %v630_v45 = vand.u32 4294901760, %v1648_v37  ;;  %v1672_v46 = vsub.f32 %v494_v30, %v1650_v38  ;;  %v611_v47 = vand.u32 4294901760, %v610_v39  ;;  %v624_v48 = vsub.f32 %v1635_v32, %v623_v40  ;;  %p1531_p3 = por %p1530_p2, %p1529_p1 }
   0xe   :  { %1284 = vmatmul.mubr.f32.vlgmr.msra.gmra.mxu0 %v108_v29  ;;  %1289 = vmatmul.mubr.f32.vlgmr.msra.gmra.mxu1 %v104_v9  ;;  %v637_v49 = vand.u32 4294901760, %v1662_v41  ;;  %v1684_v50 = vsub.f32 %v493_v34, %v1664_v42  ;;  %v618_v51 = vand.u32 4294901760, %v617_v44  ;;  %v1732_v0 = vand.u32 4294901760, %v492_v63  ;;  %v487_v29 = vld [vmem:[%s2022_s3 + $0x10] sm:$0xff]  ;;  %v486_v44 = vld [vmem:[%s2022_s3 + $0x8] sm:$0xff] }
   0xf   :  { %1292 = vmatpush3.msra.mxu0 %v146_v11  ;;  %1296 = vmatprep.subr.mxu1 %v1546_v2  ;;  %v631_v52 = vsub.f32 %v1648_v37, %v630_v45  ;;  %v644_v53 = vand.u32 4294901760, %v1672_v46  ;;  %v625_v54 = vand.u32 4294901760, %v624_v48  ;;  %v1740_v4 = vand.u32 4294901760, %v491_v1  ;;  %p1532_p4 = pnand %p1531_p3, %p1525_p0 }
  0x10   :  { %1297 = vmatpush3.msra.mxu1 %v69_v6  ;;  %1293 = vmatprep.mubr.msk.f32.mxu0 %vm1547_vm1, %v1546_v2  ;;  %v638_v55 = vsub.f32 %v1662_v41, %v637_v49  ;;  %v651_v56 = vand.u32 4294901760, %v1684_v50  ;;  %v1738_v3 = vsub.f32 %v492_v63, %v1732_v0  ;;  %v1790_v39 = vand.u32 4294901760, %v487_v29 }
  0x11   :  { %1301 = vmatprep.subr.mxu0 %v1546_v2  ;;  %1298 = vmatprep.mubr.msk.f32.mxu1 %vm1547_vm1, %v1546_v2  ;;  %v632_v57 = vand.u32 4294901760, %v631_v52  ;;  %v645_v58 = vsub.f32 %v1672_v46, %v644_v53  ;;  %v1749_v7 = vsub.f32 %v491_v1, %v1740_v4  ;;  %v1806_v52 = vand.u32 4294901760, %v486_v44 }
  0x12   :  { %1294 = vmatmul.mubr.f32.vlgmr.msra.gmra.mxu0 %v105_v13  ;;  %1299 = vmatmul.mubr.f32.vlgmr.msra.gmra.mxu1 %v106_v18  ;;  %v639_v59 = vand.u32 4294901760, %v638_v55  ;;  %v652_v60 = vsub.f32 %v1684_v50, %v651_v56  ;;  %v488_v18 = vld [vmem:[%s2022_s3 + $0x18] sm:$0xff]  ;;  %v485_v55 = vld [vmem:[%s2022_s3] sm:$0xff]  ;;  %vm1149_vm3 = vcmask 654336  }
  0x13   :  { %1302 = vmatpush3.msra.mxu0 %v147_v15  ;;  %1306 = vmatprep.subr.mxu1 %v1546_v2  ;;  %v646_v61 = vand.u32 4294901760, %v645_v58  ;;  %v665_v13 = vand.u32 4294901760, %v1749_v7  ;;  %v1765_v15 = vand.u32 4294901760, %v489_v10  ;;  %v1780_v25 = vand.u32 4294901760, %v488_v18 }
  0x14   :  { %1307 = vmatpush3.msra.mxu1 %v69_v6  ;;  %1303 = vmatprep.mubr.msk.f32.mxu0 %vm1547_vm1, %v1546_v2  ;;  %v653_v62 = vand.u32 4294901760, %v652_v60  ;;  %v658_v6 = vand.u32 4294901760, %v1738_v3  ;;  %v1819_v60 = vand.u32 4294901760, %v485_v55 }
  0x15   :  { %1308 = vmatprep.mubr.msk.f32.mxu1 %vm1547_vm1, %v1546_v2  ;;  %1346 = vmatprep.subr.mxu1 %v1546_v2  ;;  %v666_v20 = vsub.f32 %v1749_v7, %v665_v13  ;;  %v1777_v24 = vsub.f32 %v489_v10, %v1765_v15 }
  0x16   :  { %1304 = vmatmul.mubr.f32.vlgmr.msra.gmra.mxu0 %v104_v9  ;;  %1309 = vmatmul.mubr.f32.vlgmr.msra.gmra.mxu1 %v104_v9  ;;  %v1751_v9 = vand.u32 4294901760, %v490_v5  ;;  %v659_v11 = vsub.f32 %v1738_v3, %v658_v6  ;;  %v1832_v1 = vsub.f32 %v485_v55, %v1819_v60 }
  0x17   :  { %1347 = vmatpush3.msra.mxu1 %v604_v43  ;;  %1311 = vmatprep.subr.mxu0 %v1546_v2  ;;  %v667_v30 = vand.u32 4294901760, %v666_v20  ;;  %v2029_v35 = vand.u32 4294901760, %v1777_v24  ;;  %v1794_v43 = vsub.f32 %v488_v18, %v1780_v25 }
  0x18   :  { %1348 = vmatprep.subr.mxu1 %v1546_v2  ;;  %1312 = vmatpush3.msra.mxu0 %v1597_v8  ;;  %v1763_v14 = vsub.f32 %v490_v5, %v1751_v9  ;;  %v660_v19 = vand.u32 4294901760, %v659_v11  ;;  %v2025_v18 = vand.u32 4294901760, %v1832_v1 }
  0x19   :  { %1349 = vmatpush3.msra.mxu1 %v611_v47  ;;  %1313 = vmatprep.subr.mxu0 %v1546_v2  ;;  %v680_v48 = vsub.f32 %v1777_v24, %v2029_v35 }
  0x1a   :  { %1350 = vmatprep.subr.mxu1 %v1546_v2  ;;  %1314 = vmatpush3.msra.mxu0 %v1602_v12  ;;  %v2030_v23 = vand.u32 4294901760, %v1763_v14  ;;  %v708_v20 = vsub.f32 %v1832_v1, %v2025_v18 }
  0x1b   :  { %1351 = vmatpush3.msra.mxu1 %v618_v51  ;;  %1315 = vmatprep.subr.mxu0 %v1546_v2  ;;  %v1804_v51 = vsub.f32 %v487_v29, %v1790_v39 }
  0x1c   :  { %1352 = vmatprep.subr.mxu1 %v1546_v2  ;;  %1316 = vmatpush3.msra.mxu0 %v1611_v17  ;;  %v673_v34 = vsub.f32 %v1763_v14, %v2030_v23  ;;  %v709_v29 = vand.u32 4294901760, %v708_v20 }
  0x1d   :  { %1353 = vmatpush3.msra.mxu1 %v625_v54  ;;  %1317 = vmatprep.subr.mxu0 %v1546_v2  ;;  %v2028_v54 = vand.u32 4294901760, %v1794_v43  ;;  %v2027_v58 = vand.u32 4294901760, %v1804_v51 }
  0x1e   :  { %1354 = vmatprep.subr.mxu1 %v1546_v2  ;;  %1318 = vmatpush3.msra.mxu0 %v1619_v22  ;;  %v674_v47 = vand.u32 4294901760, %v673_v34 }
  0x1f   :  { %1355 = vmatpush3.msra.mxu1 %v632_v57  ;;  %1319 = vmatprep.subr.mxu0 %v1546_v2  ;;  %v681_v57 = vand.u32 4294901760, %v680_v48 }
  0x20   :  { %1356 = vmatprep.subr.mxu1 %v1546_v2  ;;  %1320 = vmatpush3.msra.mxu0 %v1628_v28 }
  0x21   :  { %1357 = vmatpush3.msra.mxu1 %v639_v59  ;;  %1321 = vmatprep.subr.mxu0 %v1546_v2  ;;  %v1817_v59 = vsub.f32 %v486_v44, %v1806_v52 }
  0x22   :  { %1358 = vmatprep.subr.mxu1 %v1546_v2  ;;  %1322 = vmatpush3.msra.mxu0 %v1637_v33 }
  0x23   :  { %1359 = vmatpush3.msra.mxu1 %v646_v61  ;;  %1323 = vmatprep.subr.mxu0 %v1546_v2  ;;  %v687_v61 = vsub.f32 %v1794_v43, %v2028_v54  ;;  %v2026_v63 = vand.u32 4294901760, %v1817_v59 }
  0x24   :  { %1360 = vmatprep.subr.mxu1 %v1546_v2  ;;  %1324 = vmatpush3.msra.mxu0 %v1650_v38 }
  0x25   :  { %1361 = vmatpush3.msra.mxu1 %v653_v62  ;;  %1325 = vmatprep.subr.mxu0 %v1546_v2  ;;  %v694_v62 = vsub.f32 %v1804_v51, %v2027_v58  ;;  %v688_v5 = vand.u32 4294901760, %v687_v61  ;;  %v701_v11 = vsub.f32 %v1817_v59, %v2026_v63 }
  0x26   :  { %1362 = vmatprep.subr.mxu1 %v1546_v2  ;;  %1326 = vmatpush3.msra.mxu0 %v1664_v42 }
  0x27   :  { %1327 = vmatprep.subr.mxu0 %v1546_v2  ;;  %1378 = vmatprep.mubr.msk.f32.mxu1 %vm1547_vm1, %v1546_v2  ;;  %v695_v10 = vand.u32 4294901760, %v694_v62 }
  0x28   :  { %1343 = vmatprep.mubr.msk.f32.mxu0 %vm1547_vm1, %v1546_v2  ;;  %1328 = vmatpush3.msra.mxu0 %v1732_v0 }
  0x29   :  { %1329 = vmatprep.subr.mxu0 %v1546_v2  ;;  %1363 = vmatpush3.msra.mxu1 %v660_v19  ;;  %v702_v19 = vand.u32 4294901760, %v701_v11 }
  0x2a   :  { %1330 = vmatpush3.msra.mxu0 %v1740_v4  ;;  %1364 = vmatprep.subr.mxu1 %v1546_v2 }
  0x2b   :  { %1331 = vmatprep.subr.mxu0 %v1546_v2  ;;  %1365 = vmatpush3.msra.mxu1 %v667_v30  ;;  %v1165_v30 = vld [vmem:[%s2021_s2] ss:$0 sm:$0xff] }
  0x2c   :  { %1332 = vmatpush3.msra.mxu0 %v1751_v9  ;;  %1366 = vmatprep.subr.mxu1 %v1546_v2 }
  0x2d   :  { %1333 = vmatprep.subr.mxu0 %v1546_v2  ;;  %1367 = vmatpush3.msra.mxu1 %v674_v47 }
  0x2e   :  { %1334 = vmatpush3.msra.mxu0 %v1765_v15  ;;  %1368 = vmatprep.subr.mxu1 %v1546_v2 }
  0x2f   :  { %1335 = vmatprep.subr.mxu0 %v1546_v2  ;;  %1369 = vmatpush3.msra.mxu1 %v681_v57 }
  0x30   :  { %1336 = vmatpush3.msra.mxu0 %v1780_v25  ;;  %1370 = vmatprep.subr.mxu1 %v1546_v2 }
  0x31   :  { %1337 = vmatprep.subr.mxu0 %v1546_v2  ;;  %1371 = vmatpush3.msra.mxu1 %v688_v5 }
  0x32   :  { %1338 = vmatpush3.msra.mxu0 %v1790_v39  ;;  %1372 = vmatprep.subr.mxu1 %v1546_v2 }
  0x33   :  { %1339 = vmatprep.subr.mxu0 %v1546_v2  ;;  %1373 = vmatpush3.msra.mxu1 %v695_v10 }
  0x34   :  { %1340 = vmatpush3.msra.mxu0 %v1806_v52  ;;  %1374 = vmatprep.subr.mxu1 %v1546_v2 }
  0x35   :  { %1341 = vmatprep.subr.mxu0 %v1546_v2  ;;  %1375 = vmatpush3.msra.mxu1 %v702_v19 }
  0x36   :  { %1342 = vmatpush3.msra.mxu0 %v1819_v60  ;;  %1376 = vmatprep.subr.mxu1 %v1546_v2 }
  0x37   :  { %1381 = vmatprep.subr.mxu0 %v1546_v2  ;;  %1377 = vmatpush3.msra.mxu1 %v709_v29 }
  0x38   :  { %1416 = vmatprep.subr.mxu1 %v1546_v2 }
  0xce   :  { %v110_v34 = vpop.f32.mrf.mxu0  ;;  %v186_v44 = vpop.f32.mrf.mxu1 }
  0xcf   :  { %v111_v47 = vadd.f32 %v1165_v30, %v110_v34 }
  0xd0   :  { %v1285_v48 = vpop.f32.mrf.mxu0  ;;  %v1290_v55 = vpop.f32.mrf.mxu1 }
  0xd1   :  { %v187_v57 = vadd.f32 %v186_v44, %v111_v47 }
  0xd2   :  { %v260_v61 = vpop.f32.mrf.mxu0  ;;  %v334_v62 = vpop.f32.mrf.mxu1 }
  0xd3   :  { %v261_v5 = vadd.f32 %v260_v61, %v187_v57 }
  0xd4   :  { %v1295_v10 = vpop.f32.mrf.mxu0  ;;  %v1300_v11 = vpop.f32.mrf.mxu1 }
  0xd5   :  { %v335_v19 = vadd.f32 %v334_v62, %v261_v5 }
  0xd6   :  { %v408_v20 = vpop.f32.mrf.mxu0  ;;  %v480_v29 = vpop.f32.mrf.mxu1 }
  0xd7   :  { %v409_v18 = vadd.f32 %v408_v20, %v335_v19 }
  0xd8   :  { %v1305_v63 = vpop.f32.mrf.mxu0  ;;  %v1310_v58 = vpop.f32.mrf.mxu1 }
  0xd9   :  { %v481_v54 = vadd.f32 %v480_v29, %v409_v18 }
  0xdb   :  { %v484_v35 = vmax.f32 %v481_v54, 0.0 }
  0xdd   :  { %v1852_v23 = vand.u32 4294901760, %v484_v35 }
  0xdf   :  { %v1855_v30 = vsub.f32 %v484_v35, %v1852_v23  ;;  %1379 = vmatmul.mubr.f32.vlgmr.msra.gmra.mxu1 %v1852_v23 }
  0xe0   :  { %1417 = vmatpush3.msra.mxu1 %v1597_v8  ;;  %1448 = vmatprep.mubr.msk.f32.mxu1 %vm1547_vm1, %v1546_v2 }
  0xe1   :  { %v591_v34 = vand.u32 4294901760, %v1855_v30  ;;  %1418 = vmatprep.subr.mxu1 %v1546_v2 }
  0xe2   :  { %1419 = vmatpush3.msra.mxu1 %v1602_v12 }
  0xe3   :  { %v592_v54 = vsub.f32 %v1855_v30, %v591_v34  ;;  %1420 = vmatprep.subr.mxu1 %v1546_v2 }
  0xe4   :  { %1421 = vmatpush3.msra.mxu1 %v1611_v17 }
  0xe5   :  { %1422 = vmatprep.subr.mxu1 %v1546_v2  ;;  %v593_v35 = vand.u32 4294901760, %v592_v54 }
  0xe6   :  { %1423 = vmatpush3.msra.mxu1 %v1619_v22 }
  0xe7   :  { %1424 = vmatprep.subr.mxu1 %v1546_v2  ;;  %1344 = vmatmul.mubr.f32.vlgmr.msra.gmra.mxu0 %v593_v35 }
  0xe8   :  { %1382 = vmatpush3.msra.mxu0 %v1609_v16  ;;  %1425 = vmatpush3.msra.mxu1 %v1628_v28  ;;  %v2033_v16 = vand.u32 4294901760, %v1794_v43 }
  0xe9   :  { %1383 = vmatprep.subr.mxu0 %v1546_v2  ;;  %1426 = vmatprep.subr.mxu1 %v1546_v2 }
  0xea   :  { %1384 = vmatpush3.msra.mxu0 %v1617_v21  ;;  %1427 = vmatpush3.msra.mxu1 %v1637_v33  ;;  %v2035_v21 = vand.u32 4294901760, %v1817_v59 }
  0xeb   :  { %1385 = vmatprep.subr.mxu0 %v1546_v2  ;;  %1428 = vmatprep.subr.mxu1 %v1546_v2 }
  0xec   :  { %1386 = vmatpush3.msra.mxu0 %v1626_v27  ;;  %1429 = vmatpush3.msra.mxu1 %v1650_v38 }
  0xed   :  { %1387 = vmatprep.subr.mxu0 %v1546_v2  ;;  %1430 = vmatprep.subr.mxu1 %v1546_v2 }
  0xee   :  { %1388 = vmatpush3.msra.mxu0 %v1635_v32  ;;  %1431 = vmatpush3.msra.mxu1 %v1664_v42 }
  0xef   :  { %1389 = vmatprep.subr.mxu0 %v1546_v2  ;;  %1432 = vmatprep.subr.mxu1 %v1546_v2 }
  0xf0   :  { %1390 = vmatpush3.msra.mxu0 %v1648_v37  ;;  %1433 = vmatpush3.msra.mxu1 %v1732_v0 }
  0xf1   :  { %1391 = vmatprep.subr.mxu0 %v1546_v2  ;;  %1434 = vmatprep.subr.mxu1 %v1546_v2 }
  0xf2   :  { %1392 = vmatpush3.msra.mxu0 %v1662_v41  ;;  %1435 = vmatpush3.msra.mxu1 %v1740_v4 }
  0xf3   :  { %1393 = vmatprep.subr.mxu0 %v1546_v2  ;;  %1436 = vmatprep.subr.mxu1 %v1546_v2 }
  0xf4   :  { %1394 = vmatpush3.msra.mxu0 %v1672_v46  ;;  %1437 = vmatpush3.msra.mxu1 %v1751_v9 }
  0xf5   :  { %1395 = vmatprep.subr.mxu0 %v1546_v2  ;;  %1438 = vmatprep.subr.mxu1 %v1546_v2 }
  0xf6   :  { %1396 = vmatpush3.msra.mxu0 %v1684_v50  ;;  %1439 = vmatpush3.msra.mxu1 %v1765_v15 }
  0xf7   :  { %1397 = vmatprep.subr.mxu0 %v1546_v2  ;;  %1440 = vmatprep.subr.mxu1 %v1546_v2 }
  0xf8   :  { %1398 = vmatpush3.msra.mxu0 %v1738_v3  ;;  %1441 = vmatpush3.msra.mxu1 %v1780_v25 }
  0xf9   :  { %1399 = vmatprep.subr.mxu0 %v1546_v2  ;;  %1442 = vmatprep.subr.mxu1 %v1546_v2 }
  0xfa   :  { %1400 = vmatpush3.msra.mxu0 %v1749_v7  ;;  %1443 = vmatpush3.msra.mxu1 %v1790_v39 }
  0xfb   :  { %1401 = vmatprep.subr.mxu0 %v1546_v2  ;;  %1444 = vmatprep.subr.mxu1 %v1546_v2 }
  0xfc   :  { %1402 = vmatpush3.msra.mxu0 %v1763_v14  ;;  %1445 = vmatpush3.msra.mxu1 %v1806_v52 }
  0xfd   :  { %1403 = vmatprep.subr.mxu0 %v1546_v2  ;;  %1446 = vmatprep.subr.mxu1 %v1546_v2 }
  0xfe   :  { %1404 = vmatpush3.msra.mxu0 %v1777_v24  ;;  %1447 = vmatpush3.msra.mxu1 %v1819_v60 }
  0xff   :  { %1405 = vmatprep.subr.mxu0 %v1546_v2  ;;  %1449 = vmatmul.mubr.f32.vlgmr.msra.gmra.mxu1 %v591_v34 }
 0x100   :  { %1486 = vmatprep.subr.mxu1 %v1546_v2  ;;  %1406 = vmatpush3.msra.mxu0 %v1794_v43 }
 0x101   :  { %1487 = vmatpush3.msra.mxu1 %v1597_v8  ;;  %1407 = vmatprep.subr.mxu0 %v1546_v2  ;;  %v2031_v8 = vand.u32 4294901760, %v1763_v14 }
 0x102   :  { %1488 = vmatprep.subr.mxu1 %v1546_v2  ;;  %1408 = vmatpush3.msra.mxu0 %v1804_v51 }
 0x103   :  { %1489 = vmatpush3.msra.mxu1 %v1602_v12  ;;  %1409 = vmatprep.subr.mxu0 %v1546_v2  ;;  %v2032_v12 = vand.u32 4294901760, %v1777_v24 }
 0x104   :  { %1490 = vmatprep.subr.mxu1 %v1546_v2  ;;  %1410 = vmatpush3.msra.mxu0 %v1817_v59 }
 0x105   :  { %1491 = vmatpush3.msra.mxu1 %v1611_v17  ;;  %1411 = vmatprep.subr.mxu0 %v1546_v2  ;;  %v2034_v17 = vand.u32 4294901760, %v1804_v51 }
 0x106   :  { %1492 = vmatprep.subr.mxu1 %v1546_v2  ;;  %1412 = vmatpush3.msra.mxu0 %v1832_v1 }
 0x107   :  { %1413 = vmatprep.mubr.msk.f32.mxu0 %vm1547_vm1, %v1546_v2  ;;  %1493 = vmatpush3.msra.mxu1 %v1619_v22  ;;  %v2036_v22 = vand.u32 4294901760, %v1832_v1 }
 0x108   :  { %1414 = vmatmul.mubr.f32.vlgmr.msra.gmra.mxu0 %v1855_v30  ;;  %1451 = vmatprep.subr.mxu0 %v1546_v2 }
 0x109   :  { %1494 = vmatprep.subr.mxu1 %v1546_v2  ;;  %1452 = vmatpush3.msra.mxu0 %v602_v26 }
 0x10a   :  { %1495 = vmatpush3.msra.mxu1 %v1628_v28  ;;  %1453 = vmatprep.subr.mxu0 %v1546_v2 }
 0x10b   :  { %1496 = vmatprep.subr.mxu1 %v1546_v2  ;;  %1454 = vmatpush3.msra.mxu0 %v609_v31 }
 0x10c   :  { %1497 = vmatpush3.msra.mxu1 %v1637_v33  ;;  %1455 = vmatprep.subr.mxu0 %v1546_v2 }
 0x10d   :  { %1498 = vmatprep.subr.mxu1 %v1546_v2  ;;  %1456 = vmatpush3.msra.mxu0 %v616_v36 }
 0x10e   :  { %1499 = vmatpush3.msra.mxu1 %v1650_v38  ;;  %1457 = vmatprep.subr.mxu0 %v1546_v2  ;;  %v1166_v38 = vld [vmem:[%s2023_s4] ss:$0 sm:$0xff] }
 0x10f   :  { %1500 = vmatprep.subr.mxu1 %v1546_v2  ;;  %1458 = vmatpush3.msra.mxu0 %v623_v40 }
 0x110   :  { %1501 = vmatpush3.msra.mxu1 %v1664_v42  ;;  %1459 = vmatprep.subr.mxu0 %v1546_v2 }
 0x111   :  { %1502 = vmatprep.subr.mxu1 %v1546_v2  ;;  %1460 = vmatpush3.msra.mxu0 %v630_v45 }
 0x112   :  { %1503 = vmatpush3.msra.mxu1 %v1732_v0  ;;  %1461 = vmatprep.subr.mxu0 %v1546_v2 }
 0x113   :  { %1504 = vmatprep.subr.mxu1 %v1546_v2  ;;  %1462 = vmatpush3.msra.mxu0 %v637_v49 }
 0x114   :  { %1505 = vmatpush3.msra.mxu1 %v1740_v4  ;;  %1463 = vmatprep.subr.mxu0 %v1546_v2 }
 0x115   :  { %1506 = vmatprep.subr.mxu1 %v1546_v2  ;;  %1464 = vmatpush3.msra.mxu0 %v644_v53 }
 0x116   :  { %1507 = vmatpush3.msra.mxu1 %v1751_v9  ;;  %1465 = vmatprep.subr.mxu0 %v1546_v2 }
 0x117   :  { %1508 = vmatprep.subr.mxu1 %v1546_v2  ;;  %1466 = vmatpush3.msra.mxu0 %v651_v56 }
 0x118   :  { %1509 = vmatpush3.msra.mxu1 %v1765_v15  ;;  %1467 = vmatprep.subr.mxu0 %v1546_v2 }
 0x119   :  { %1510 = vmatprep.subr.mxu1 %v1546_v2  ;;  %1468 = vmatpush3.msra.mxu0 %v658_v6 }
 0x11a   :  { %1511 = vmatpush3.msra.mxu1 %v1780_v25  ;;  %1469 = vmatprep.subr.mxu0 %v1546_v2 }
 0x11b   :  { %1512 = vmatprep.subr.mxu1 %v1546_v2  ;;  %1470 = vmatpush3.msra.mxu0 %v665_v13 }
 0x11c   :  { %1513 = vmatpush3.msra.mxu1 %v1790_v39  ;;  %1471 = vmatprep.subr.mxu0 %v1546_v2 }
 0x11d   :  { %1514 = vmatprep.subr.mxu1 %v1546_v2  ;;  %1472 = vmatpush3.msra.mxu0 %v2031_v8 }
 0x11e   :  { %1515 = vmatpush3.msra.mxu1 %v1806_v52  ;;  %1473 = vmatprep.subr.mxu0 %v1546_v2 }
 0x11f   :  { %1516 = vmatprep.subr.mxu1 %v1546_v2  ;;  %1474 = vmatpush3.msra.mxu0 %v2032_v12 }
 0x120   :  { %1517 = vmatpush3.msra.mxu1 %v1819_v60  ;;  %1518 = vmatprep.mubr.msk.f32.mxu1 %vm1547_vm1, %v1546_v2 }
 0x121   :  { %1475 = vmatprep.subr.mxu0 %v1546_v2  ;;  %1519 = vmatmul.mubr.f32.vlgmr.msra.gmra.mxu1 %v1852_v23 }
 0x122   :  { %1476 = vmatpush3.msra.mxu0 %v2033_v16  ;;  %1483 = vmatprep.mubr.msk.f32.mxu0 %vm1547_vm1, %v1546_v2 }
 0x123   :  { %1477 = vmatprep.subr.mxu0 %v1546_v2 }
 0x124   :  { %1478 = vmatpush3.msra.mxu0 %v2034_v17 }
 0x125   :  { %1479 = vmatprep.subr.mxu0 %v1546_v2 }
 0x126   :  { %1480 = vmatpush3.msra.mxu0 %v2035_v21 }
 0x127   :  { %1481 = vmatprep.subr.mxu0 %v1546_v2 }
 0x128   :  { %1482 = vmatpush3.msra.mxu0 %v2036_v22 }
 0x129   :  { %1484 = vmatmul.mubr.f32.vlgmr.msra.gmra.mxu0 %v1852_v23 }
 0x19f   :  { %v746_v26 = vpop.f32.mrf.mxu1 }
 0x1a1   :  { %v1380_v27 = vpop.f32.mrf.mxu1 }
 0x1a7   :  { %v595_v28 = vpop.f32.mrf.mxu0 }
 0x1a8   :  { %v596_v40 = vadd.f32 %v1166_v38, %v595_v28 }
 0x1a9   :  { %v1345_v31 = vpop.f32.mrf.mxu0 }
 0x1aa   :  { %v747_v2 = vadd.f32 %v746_v26, %v596_v40 }
 0x1bf   :  { %v939_v32 = vpop.f32.mrf.mxu1 }
 0x1c1   :  { %v1450_v33 = vpop.f32.mrf.mxu1 }
 0x1c8   :  { %v850_v36 = vpop.f32.mrf.mxu0 }
 0x1c9   :  { %v851_v45 = vadd.f32 %v850_v36, %v747_v2 }
 0x1ca   :  { %v1415_v37 = vpop.f32.mrf.mxu0 }
 0x1cb   :  { %v940_v46 = vadd.f32 %v939_v32, %v851_v45 }
 0x1e1   :  { %v1145_v41 = vpop.f32.mrf.mxu1 }
 0x1e3   :  { %v1520_v42 = vpop.f32.mrf.mxu1 }
 0x1e9   :  { %v1058_v49 = vpop.f32.mrf.mxu0 }
 0x1ea   :  { %v1059_v50 = vadd.f32 %v1058_v49, %v940_v46 }
 0x1eb   :  { %v1485_v53 = vpop.f32.mrf.mxu0 }
 0x1ec   :  { %v1146_v56 = vadd.f32 %v1145_v41, %v1059_v50 }
 0x1ee   :  { %1150 = vst.msk [vmem:[#allocation2] sm:$0xff] %vm1149_vm3, %v1146_v56 }
 0x1ef   :  { %1535 = shalt.err (!%p1532_p4)
}
 0x1f0   :  { %1160 = dma.vmem_to_hbm [thread:$0]  %s1158_s28, 128, %s2024_s5, [#allocation3]  }
 0x1f1   :  { %1544 = dma.done.wait [#allocation3], 128  }
 0x1f2   :  { %1545 = vsyncadd [#allocation3], 4294967168 }
 0x1f3   :  { %1164 = vsyncpa [#allocation3], 1 }

</bundles_post_ra>
